<compile_context>
chip_gen: v7x
topology: tpu7x:2x2x1
jax: 0.10.0
libtpu: 0.0.40
codegen_flags: <defaults>
</compile_context>

<pallas_src>
import functools

import jax
import jax.numpy as jnp
from jax.experimental import pallas as pl
from jax.experimental.pallas import tpu as pltpu


def find_multiple(n: int, k: int) -> int:
    if n % k == 0:
        return n
    return n + k - n % k


def _vmem_capacity_bytes() -> int:
    try:
        info = pltpu.get_tpu_info()
        cap = getattr(info, "vmem_capacity_bytes", None)
        if cap:
            return int(cap)
    except Exception:
        pass
    return 64 * 1024 * 1024  # conservative default (v7x per-TC)


def _pick_tile(total: int, target: int, quantum: int) -> int:
    """Largest multiple of `quantum` that divides `total` and is <= target."""
    best = quantum
    t = quantum
    limit = min(total, max(target, quantum))
    while t <= limit:
        if total % t == 0:
            best = t
        t += quantum
    return best


def moe_kernel(eids_ref, nact_ref, comb_ref, x_ref, w13_ref, w2_ref,
               o_ref, acc_ref, *, ti):
    k = pl.program_id(1)          # intermediate-dim tile
    e = pl.program_id(2)          # compacted expert step
    nk = pl.num_programs(1)
    ne = pl.num_programs(2)

    @pl.when(jnp.logical_and(k == 0, e == 0))
    def _init():
        acc_ref[...] = jnp.zeros_like(acc_ref)

    # Skip compute for padded (inactive) expert steps; their weight DMAs are
    # already de-duplicated because padded entries repeat the previous step's
    # block index (e is the fastest-varying grid axis).
    @pl.when(e < nact_ref[0])
    def _compute():
        x = x_ref[...]                          # (TT, D)      bf16
        w13 = w13_ref[...]                      # (D, 2*TI)    bf16 (fused w1|w3)
        w2 = w2_ref[...]                        # (TI, D)      bf16

        # single fused gate/up projection on the MXU, f32 accumulate
        gu = jnp.dot(x, w13, preferred_element_type=jnp.float32)   # (TT, 2*TI)
        g = gu[:, :ti]
        u = gu[:, ti:]
        h = (jax.nn.silu(g) * u).astype(jnp.bfloat16)               # torch-like bf16
        # down projection (partial over this I tile)
        y = jnp.dot(h, w2, preferred_element_type=jnp.float32)      # (TT, D)

        c = comb_ref[e]                         # (TT, 1) f32 combine weight
        acc_ref[...] += c * y

    @pl.when(jnp.logical_and(k == nk - 1, e == ne - 1))
    def _finalize():
        o_ref[...] = acc_ref[...].astype(o_ref.dtype)


def moe_feed_forward_after_gating(x, expert_weights, expert_indices, w1, w2, w3,
                                  *, tt=None, ti=None):
    """x: (T, D) bf16; expert_weights: (T, A) f32; expert_indices: (T, A) i32;
    w1/w3: (E, I, D) bf16; w2: (E, D, I) bf16.  Returns (T, D) bf16."""
    T, D = x.shape
    E, I, _ = w1.shape
    A = expert_weights.shape[-1]

    assert D % 128 == 0, "model dim must be lane-aligned"
    assert I % 128 == 0, "intermediate dim must be lane-aligned"

    vmem_cap = _vmem_capacity_bytes()
    big_vmem = vmem_cap >= 100 * 1024 * 1024   # v5e / v6e (128 MiB)

    # Pad tokens to a multiple of 16 (bf16 sublane packing).
    T_pad = find_multiple(T, 16)

    if ti is None:
        ti_target = 1024 if big_vmem else (256 if D >= 4096 else 512)
        ti = _pick_tile(I, ti_target, 128)
    if tt is None:
        tt_target = 512 if big_vmem else 256
        tt = _pick_tile(T_pad, tt_target, 16)

    assert ti % 128 == 0 and I % ti == 0, "I tile must divide I, multiple of 128"
    assert tt % 16 == 0 and T_pad % tt == 0, "token tile must divide padded T, x16"
    nk = I // ti

    # ---- gating glue (plain JAX): normalize top-k weights, scatter to dense
    # per-expert combine matrix comb[t, e], compact the active experts. ----
    norm_w = expert_weights / jnp.sum(expert_weights, axis=-1, keepdims=True)
    one_hot = jax.nn.one_hot(expert_indices, E, dtype=jnp.float32)        # (T, A, E)
    comb = jnp.einsum('ta,tae->te', norm_w.astype(jnp.float32), one_hot)  # (T, E)

    # Expert grid axis is bounded by min(E, T*A): top-k gating can activate at
    # most T*A experts.
    ne_grid = min(E, T * A)

    active = jnp.any(comb != 0.0, axis=0)                                 # (E,)
    n_active = jnp.sum(active).astype(jnp.int32)
    order = jnp.argsort(jnp.where(active, 0, 1).astype(jnp.int32))        # active first (stable)
    last_active = order[jnp.maximum(n_active - 1, 0)]
    order_g = order[:ne_grid]
    # pad tail with the last active id so padded steps reuse the same block
    eids = jnp.where(jnp.arange(ne_grid) < n_active, order_g,
                     last_active).astype(jnp.int32)
    nact = jnp.reshape(n_active, (1,))

    # Pad tokens; padded rows have zero combine weight so they contribute 0.
    if T_pad != T:
        x_in = jnp.pad(x, ((0, T_pad - T), (0, 0)))
        comb = jnp.pad(comb, ((0, T_pad - T), (0, 0)))
    else:
        x_in = x

    # comb pre-permuted to compacted expert order: kernel indexes by grid e.
    comb_in = jnp.transpose(comb)[order_g][:, :, None]       # (ne_grid, T_pad, 1)

    # ---- k-major contiguous, fused weight layouts (one-time wrapper cost; a
    # real model would store parameters in this layout). ----
    w1t = jnp.transpose(jnp.swapaxes(w1, 1, 2).reshape(E, D, nk, ti), (0, 2, 1, 3))
    w3t = jnp.transpose(jnp.swapaxes(w3, 1, 2).reshape(E, D, nk, ti), (0, 2, 1, 3))
    w13 = jnp.concatenate([w1t, w3t], axis=-1)                # (E, nk, D, 2*ti)
    w2t = jnp.swapaxes(w2, 1, 2).reshape(E, nk, ti, D)        # (E, nk, ti, D)

    grid = (T_pad // tt, nk, ne_grid)

    # VMEM budget: double-buffered weight tiles + residents + compiler temps.
    bf = 2
    vmem_est = (
        2 * (D * (2 * ti) * bf + ti * D * bf)     # w13 + w2 tiles, double-buffered
        + 2 * tt * D * bf                         # x
        + 2 * ne_grid * tt * 4                    # comb
        + 2 * tt * D * bf                         # output
        + tt * D * 4                              # f32 accumulator scratch
        + tt * (2 * ti) * 4 + tt * ti * bf + tt * D * 4   # gu / h / y temporaries
    )
    vmem_limit = int(min(max(int(1.4 * vmem_est), 8 * 1024 * 1024),
                         int(0.85 * vmem_cap)))

    grid_spec = pltpu.PrefetchScalarGridSpec(
        num_scalar_prefetch=2,
        grid=grid,
        in_specs=[
            # comb: resident per token tile (constant over k, e), expert-ordered
            pl.BlockSpec((ne_grid, tt, 1),
                         lambda t, k, e, eids, nact: (0, t, 0)),
            # x: resident per token tile
            pl.BlockSpec((tt, D),
                         lambda t, k, e, eids, nact: (t, 0)),
            # fused w1|w3 tile: contiguous (D, 2*ti) read
            pl.BlockSpec((None, None, D, 2 * ti),
                         lambda t, k, e, eids, nact: (eids[e], k, 0, 0)),
            # w2 tile: contiguous (ti, D) read
            pl.BlockSpec((None, None, ti, D),
                         lambda t, k, e, eids, nact: (eids[e], k, 0, 0)),
        ],
        out_specs=pl.BlockSpec((tt, D), lambda t, k, e, eids, nact: (t, 0)),
        scratch_shapes=[pltpu.VMEM((tt, D), jnp.float32)],
    )

    out = pl.pallas_call(
        functools.partial(moe_kernel, ti=ti),
        out_shape=jax.ShapeDtypeStruct((T_pad, D), x.dtype),
        grid_spec=grid_spec,
        compiler_params=pltpu.CompilerParams(
            dimension_semantics=("parallel", "arbitrary", "arbitrary"),
            vmem_limit_bytes=vmem_limit),
    )(eids, nact, comb_in, x_in, w13, w2t)

    return out[:T]


def moe_reference(x, expert_weights, expert_indices, w1, w2, w3):
    """Pure-JAX reference mirroring the PyTorch _forward_single semantics."""
    norm_w = expert_weights / jnp.sum(expert_weights, axis=-1, keepdims=True)
    w1g = w1[expert_indices].astype(jnp.float32)   # (T, A, I, D)
    w3g = w3[expert_indices].astype(jnp.float32)   # (T, A, I, D)
    w2g = w2[expert_indices].astype(jnp.float32)   # (T, A, D, I)
    xf = x.astype(jnp.float32)
    x1 = jax.nn.silu(jnp.einsum('ti,taoi->tao', xf, w1g))
    x3 = jnp.einsum('ti,taoi->tao', xf, w3g)
    h = (x1 * x3).astype(jnp.bfloat16).astype(jnp.float32)
    eo = jnp.einsum('tao,taio->tai', h, w2g)
    return jnp.einsum('tai,ta->ti', eo, norm_w.astype(jnp.float32))


if __name__ == "__main__":
    # Small config consistent with ModelArgs: dim=128, intermediate_size=256,
    # num_experts=8, num_activated_experts=2, T=8 tokens.
    T, D, I, E, A = 8, 128, 256, 8, 2

    key = jax.random.PRNGKey(0)
    k_w1, k_w2, k_w3, k_x, k_gw, k_gi = jax.random.split(key, 6)

    w1 = (jax.random.normal(k_w1, (E, I, D), jnp.float32) * 0.05).astype(jnp.bfloat16)
    w2 = (jax.random.normal(k_w2, (E, D, I), jnp.float32) * 0.05).astype(jnp.bfloat16)
    w3 = (jax.random.normal(k_w3, (E, I, D), jnp.float32) * 0.05).astype(jnp.bfloat16)

    x = (jax.random.normal(k_x, (T, D), jnp.float32)).astype(jnp.bfloat16)
    expert_weights = jax.random.uniform(k_gw, (T, A), jnp.float32, 0.1, 1.0)
    expert_indices = jax.random.randint(k_gi, (T, A), 0, E, jnp.int32)

    # ti=128 exercises the I-tiled reduction axis (I // ti = 2 tiles).
    out = moe_feed_forward_after_gating(x, expert_weights, expert_indices,
                                        w1, w2, w3, ti=128)
    out = jax.block_until_ready(out)

    ref = moe_reference(x, expert_weights, expert_indices, w1, w2, w3)
    assert out.shape == (T, D) and out.dtype == jnp.bfloat16
    assert jnp.allclose(out.astype(jnp.float32), ref, rtol=5e-2, atol=5e-2), (
        "mismatch vs reference")

    print("KERNEL_OK")
</pallas_src>

<mosaic_0001>
module attributes {stable_mosaic.version = 11 : i64} {
  func.func @moe_kernel(%arg0: i32, %arg1: i32, %arg2: i32, %arg3: memref<8xi32, #tpu.memory_space<smem>>, %arg4: memref<1xi32, #tpu.memory_space<smem>>, %arg5: memref<8x16x1xf32, #tpu.memory_space<vmem>>, %arg6: memref<16x128xbf16, #tpu.memory_space<vmem>>, %arg7: memref<1x1x128x256xbf16, #tpu.memory_space<vmem>>, %arg8: memref<1x1x128x128xbf16, #tpu.memory_space<vmem>>, %arg9: memref<16x128xbf16, #tpu.memory_space<vmem>>, %arg10: memref<16x128xf32, #tpu.memory_space<vmem>>) attributes {dimension_semantics = [#tpu.dimension_semantics<parallel>, #tpu.dimension_semantics<arbitrary>, #tpu.dimension_semantics<arbitrary>], iteration_bounds = array<i64: 1, 2, 8>, scalar_prefetch = 2 : i64, scratch_operands = 1 : i64, tpu.core_type = #tpu.core_type<tc>, window_params = [{transform_indices = @transform_0, window_bounds = array<i64: 8, 16, 1>}, {transform_indices = @transform_1, window_bounds = array<i64: 16, 128>}, {transform_indices = @transform_2, window_bounds = array<i64: 1, 1, 128, 256>}, {transform_indices = @transform_3, window_bounds = array<i64: 1, 1, 128, 128>}, {transform_indices = @transform_4, window_bounds = array<i64: 16, 128>}]} {
    %c0_i32 = arith.constant 0 : i32
    %0 = arith.cmpi eq, %arg1, %c0_i32 : i32
    %c0_i32_0 = arith.constant 0 : i32
    %1 = arith.cmpi eq, %arg2, %c0_i32_0 : i32
    %2 = arith.andi %0, %1 : i1
    %3 = arith.extui %2 : i1 to i32
    %c0_i32_1 = arith.constant 0 : i32
    %4 = arith.cmpi ne, %3, %c0_i32_1 : i32
    scf.if %4 {
      %cst = arith.constant 0.000000e+00 : f32
      %14 = vector.broadcast %cst : f32 to vector<16x128xf32>
      %c0_4 = arith.constant 0 : index
      %c0_5 = arith.constant 0 : index
      %15 = vector.load %arg10[%c0_4, %c0_5] : memref<16x128xf32, #tpu.memory_space<vmem>>, vector<16x128xf32>
      tpu.vector_store %arg10[%c0_4, %c0_5], %14 {strides = array<i32>} : memref<16x128xf32, #tpu.memory_space<vmem>>, vector<16x128xf32>,
    } else {
    }
    %c0 = arith.constant 0 : index
    %5 = memref.load %arg4[%c0] : memref<1xi32, #tpu.memory_space<smem>>
    %6 = arith.cmpi slt, %arg2, %5 : i32
    %7 = arith.extui %6 : i1 to i32
    %c0_i32_2 = arith.constant 0 : i32
    %8 = arith.cmpi ne, %7, %c0_i32_2 : i32
    scf.if %8 {
      %c0_4 = arith.constant 0 : index
      %c0_5 = arith.constant 0 : index
      %14 = vector.load %arg6[%c0_4, %c0_5] : memref<16x128xbf16, #tpu.memory_space<vmem>>, vector<16x128xbf16>
      %c0_6 = arith.constant 0 : index
      %c0_7 = arith.constant 0 : index
      %c0_8 = arith.constant 0 : index
      %c0_9 = arith.constant 0 : index
      %15 = vector.load %arg7[%c0_6, %c0_7, %c0_8, %c0_9] : memref<1x1x128x256xbf16, #tpu.memory_space<vmem>>, vector<1x1x128x256xbf16>
      %16 = vector.shape_cast %15 : vector<1x1x128x256xbf16> to vector<128x256xbf16>
      %c0_10 = arith.constant 0 : index
      %c0_11 = arith.constant 0 : index
      %c0_12 = arith.constant 0 : index
      %c0_13 = arith.constant 0 : index
      %17 = vector.load %arg8[%c0_10, %c0_11, %c0_12, %c0_13] : memref<1x1x128x128xbf16, #tpu.memory_space<vmem>>, vector<1x1x128x128xbf16>
      %18 = vector.shape_cast %17 : vector<1x1x128x128xbf16> to vector<128x128xbf16>
      %cst = arith.constant dense<0.000000e+00> : vector<16x256xf32>
      %19 = tpu.matmul %14, %16, %cst {dimension_numbers = #tpu.dot_dimension_numbers<[1], [0], [0], [1], [0, 0, 1, 1], [], []>} : vector<16x128xbf16>, vector<128x256xbf16>, vector<16x256xf32> -> vector<16x256xf32>
      %20 = vector.extract_strided_slice %19 {offsets = [0, 0], sizes = [16, 128], strides = [1, 1]} : vector<16x256xf32> to vector<16x128xf32>
      %21 = vector.extract_strided_slice %19 {offsets = [0, 128], sizes = [16, 128], strides = [1, 1]} : vector<16x256xf32> to vector<16x128xf32>
      %22 = arith.negf %20 : vector<16x128xf32>
      %23 = math.exp %22 : vector<16x128xf32>
      %cst_14 = arith.constant 1.000000e+00 : f32
      %24 = vector.broadcast %cst_14 : f32 to vector<16x128xf32>
      %25 = arith.addf %24, %23 : vector<16x128xf32>
      %26 = arith.divf %24, %25 : vector<16x128xf32>
      %27 = arith.mulf %20, %26 : vector<16x128xf32>
      %28 = arith.mulf %27, %21 : vector<16x128xf32>
      %29 = arith.truncf %28 : vector<16x128xf32> to vector<16x128xbf16>
      %cst_15 = arith.constant dense<0.000000e+00> : vector<16x128xf32>
      %30 = tpu.matmul %29, %18, %cst_15 {dimension_numbers = #tpu.dot_dimension_numbers<[1], [0], [0], [1], [0, 0, 1, 1], [], []>} : vector<16x128xbf16>, vector<128x128xbf16>, vector<16x128xf32> -> vector<16x128xf32>
      %31 = arith.index_cast %arg2 : i32 to index
      %c0_16 = arith.constant 0 : index
      %c0_17 = arith.constant 0 : index
      %32 = vector.load %arg5[%31, %c0_16, %c0_17] : memref<8x16x1xf32, #tpu.memory_space<vmem>>, vector<1x16x1xf32>
      %33 = vector.shape_cast %32 : vector<1x16x1xf32> to vector<16x1xf32>
      %c0_18 = arith.constant 0 : index
      %c0_19 = arith.constant 0 : index
      %34 = vector.load %arg10[%c0_18, %c0_19] : memref<16x128xf32, #tpu.memory_space<vmem>>, vector<16x128xf32>
      %35 = vector.broadcast %33 : vector<16x1xf32> to vector<16x128xf32>
      %36 = arith.mulf %35, %30 : vector<16x128xf32>
      %37 = arith.addf %34, %36 : vector<16x128xf32>
      %c0_20 = arith.constant 0 : index
      %c0_21 = arith.constant 0 : index
      %38 = vector.load %arg10[%c0_20, %c0_21] : memref<16x128xf32, #tpu.memory_space<vmem>>, vector<16x128xf32>
      tpu.vector_store %arg10[%c0_20, %c0_21], %37 {strides = array<i32>} : memref<16x128xf32, #tpu.memory_space<vmem>>, vector<16x128xf32>,
    } else {
    }
    %c1_i32 = arith.constant 1 : i32
    %9 = arith.cmpi eq, %arg1, %c1_i32 : i32
    %c7_i32 = arith.constant 7 : i32
    %10 = arith.cmpi eq, %arg2, %c7_i32 : i32
    %11 = arith.andi %9, %10 : i1
    %12 = arith.extui %11 : i1 to i32
    %c0_i32_3 = arith.constant 0 : i32
    %13 = arith.cmpi ne, %12, %c0_i32_3 : i32
    scf.if %13 {
      %c0_4 = arith.constant 0 : index
      %c0_5 = arith.constant 0 : index
      %14 = vector.load %arg10[%c0_4, %c0_5] : memref<16x128xf32, #tpu.memory_space<vmem>>, vector<16x128xf32>
      %15 = arith.truncf %14 : vector<16x128xf32> to vector<16x128xbf16>
      %c0_6 = arith.constant 0 : index
      %c0_7 = arith.constant 0 : index
      %16 = vector.load %arg9[%c0_6, %c0_7] : memref<16x128xbf16, #tpu.memory_space<vmem>>, vector<16x128xbf16>
      tpu.vector_store %arg9[%c0_6, %c0_7], %15 {strides = array<i32>} : memref<16x128xbf16, #tpu.memory_space<vmem>>, vector<16x128xbf16>,
    } else {
    }
    return
  }
  func.func @transform_0(%arg0: i32, %arg1: i32, %arg2: i32, %arg3: memref<8xi32, #tpu.memory_space<smem>>, %arg4: memref<1xi32, #tpu.memory_space<smem>>) -> (i32, i32, i32) {
    %c0_i32 = arith.constant 0 : i32
    %c0_i32_0 = arith.constant 0 : i32
    %c0_i32_1 = arith.constant 0 : i32
    return %c0_i32, %arg0, %c0_i32_0 : i32, i32, i32
  }
  func.func @transform_1(%arg0: i32, %arg1: i32, %arg2: i32, %arg3: memref<8xi32, #tpu.memory_space<smem>>, %arg4: memref<1xi32, #tpu.memory_space<smem>>) -> (i32, i32) {
    %c0_i32 = arith.constant 0 : i32
    %c0_i32_0 = arith.constant 0 : i32
    return %arg0, %c0_i32 : i32, i32
  }
  func.func @transform_2(%arg0: i32, %arg1: i32, %arg2: i32, %arg3: memref<8xi32, #tpu.memory_space<smem>>, %arg4: memref<1xi32, #tpu.memory_space<smem>>) -> (i32, i32, i32, i32) {
    %0 = arith.index_cast %arg2 : i32 to index
    %1 = memref.load %arg3[%0] : memref<8xi32, #tpu.memory_space<smem>>
    %c0_i32 = arith.constant 0 : i32
    %c0_i32_0 = arith.constant 0 : i32
    %c0_i32_1 = arith.constant 0 : i32
    return %1, %arg1, %c0_i32, %c0_i32_0 : i32, i32, i32, i32
  }
  func.func @transform_3(%arg0: i32, %arg1: i32, %arg2: i32, %arg3: memref<8xi32, #tpu.memory_space<smem>>, %arg4: memref<1xi32, #tpu.memory_space<smem>>) -> (i32, i32, i32, i32) {
    %0 = arith.index_cast %arg2 : i32 to index
    %1 = memref.load %arg3[%0] : memref<8xi32, #tpu.memory_space<smem>>
    %c0_i32 = arith.constant 0 : i32
    %c0_i32_0 = arith.constant 0 : i32
    %c0_i32_1 = arith.constant 0 : i32
    return %1, %arg1, %c0_i32, %c0_i32_0 : i32, i32, i32, i32
  }
  func.func @transform_4(%arg0: i32, %arg1: i32, %arg2: i32, %arg3: memref<8xi32, #tpu.memory_space<smem>>, %arg4: memref<1xi32, #tpu.memory_space<smem>>) -> (i32, i32) {
    %c0_i32 = arith.constant 0 : i32
    %c0_i32_0 = arith.constant 0 : i32
    return %arg0, %c0_i32 : i32, i32
  }
}

</mosaic_0001>

<bundles_post_ra>
// kernel: tpu_custom_call.1
= control target key start
LH: loop header
LB: loop body
LE: loop exit
PB: predicated region body
PF: predicated region fallthrough
CT: control target
= control target key end

     0   :  { %s1652_s0 = inlined_call_operand.vmem [shape: s32[8], index: 0, kind: input, shape index: {}]   ;;  %s1653_s1 = inlined_call_operand.<no memory space> [shape: s32[1], index: 1, kind: input, shape index: {}]   ;;  %s1654_s2 = inlined_call_operand.vmem [shape: f32[8,16,1], index: 2, kind: input, shape index: {}]   ;;  %s1655_s3 = inlined_call_operand.vmem [shape: bf16[16,128], index: 3, kind: input, shape index: {}]   ;;  %s1656_s4 = inlined_call_operand.hbm [shape: bf16[8,2,128,256], index: 4, kind: input, shape index: {}]   ;;  %s1657_s5 = inlined_call_operand.hbm [shape: bf16[8,2,128,128], index: 5, kind: input, shape index: {}]   ;;  %s1658_s6 = inlined_call_operand.hbm [shape: bf16[16,128], index: 6, kind: output, shape index: {}]  }
   0x1   :  { %1666 = sst [smem:[#allocation23_spill]] %s1654_s2  ;;  %s11_s23 = sshll.u32 %s1652_s0, 4  ;;  %s12_s23 = int_to_ptr.vmem [resolvable:$true] %s11_s23 }
   0x2   :  { %1667 = sst [smem:[#allocation24_spill]] %s1655_s3  ;;  %s1056_s26 = scalar_lea.vmem %s12_s23, 16 }
   0x3   :  { %1668 = sst [smem:[#allocation25_spill]] %s1658_s6  ;;  %p1057_p0 = scmp.ne.s32.totalorder %s12_s23, %s1056_s26 }
   0x4   :  { %15 = sst [smem:[#allocation5]] %s1653_s1  ;;  %p1061_p1 = scmp.lt.s32.totalorder %s12_s23, %s12_s23 }
   0x5   :  { %p1062_p2 = scmp.lt.s32.totalorder %s1056_s26, %s1056_s26 }
   0x7   :  { %p1063_p3 = por %p1062_p2, %p1061_p1 }
   0x9   :  { %p1064_p4 = pnand %p1063_p3, %p1057_p0 }
   0xb   :  { %1067 = shalt.err (!%p1064_p4)  }
   0xc   :  { %s1256_s27 = smov [#allocation4]  }
   0xd   :  { %14 = dma.vmem_to_smem %s12_s23, 16, %s1256_s27, [#allocation3] }
   0xe   :  { %1198 = dma.done.wait [#allocation3], 16 }
   0xf   :  { %1199 = vsyncadd [#allocation3], 4294967280 }
  0x10   :  { %17 = sfence }
  0x11   :  { %18 = vsyncpa [#allocation7], 0 }
  0x12   :  { %20 = vsyncpa [#allocation7 + $0x1], 0 }
  0x13   :  { %21 = vsyncpa [#allocation10], 0 }
  0x14   :  { %23 = vsyncpa [#allocation10 + $0x1], 0 }
  0x15   :  { %24 = vsyncpa [#allocation8], 0  ;;  %s1311_s0 = smov 0   ;;  %s1313_s1 = smov 0  }
  0x16   :  { %s1315_s28 = smov 0   ;;  %s1317_s29 = smov 0  }
  0x17   :  { %s1319_s30 = smov 0   ;;  %s1321_s7 = smov 0  }
  0x18   :  { %s1323_s8 = smov 0   ;;  %s1325_s9 = smov 0  }
  0x19   :  { %s1327_s10 = smov 0   ;;  %s1329_s11 = smov 0  }
  0x1a   :  { %s1331_s12 = smov 0  }
  0x1b LB: > { %1669 = sst [smem:[#allocation20_spill]] %s1234_s7  ;;  %s1659_s13 = sadd.s32 4294967295, %s1254_s12   ;;  %s1254_s12 = sphi %s1331_s12, %s30_s12   ;;  %s1250_s11 = sphi %s1329_s11, %s1701_s11   ;;  %s1246_s10 = sphi %s1327_s10, %s1700_s10   ;;  %s1242_s9 = sphi %s1325_s9, %s1699_s9   ;;  %s1238_s8 = sphi %s1323_s8, %s1698_s8   ;;  %s1234_s7 = sphi %s1321_s7, %s1691_s7   ;;  %s1230_s30 = sphi %s1319_s30, %s1697_s30   ;;  %s1226_s29 = sphi %s1317_s29, %s1696_s29   ;;  %s1222_s28 = sphi %s1315_s28, %s1695_s28   ;;  %s1218_s1 = sphi %s1313_s1, %s1694_s1   ;;  %s1214_s0 = sphi %s1311_s0, %s1693_s0  }
  0x1c   : > { %s42_s14 = sadd.s32 1, %s1246_s10  ;;  %s45_s15 = sadd.s32 1, %s1250_s11 }
  0x1d   : > { %p43_p5 = scmp.ge.s32.totalorder %s42_s14, 8  ;;  %s105_s16 = sld [smem:[#allocation4 + %s1246_s10]] }
  0x1e   : > { %s112_s17 = sadd.s32 1, %s1234_s7  ;;  %p119_p6 = scmp.ne.s32.totalorder %s1234_s7, %s1230_s30 }
  0x1f   : > { %s1703_s14 = smov (%p43_p5, %s42_s14), 0  ;;  %s1705_s15 = smov (!%p43_p5, %s45_s15), %s1250_s11 }
  0x20   : > { %s106_s18 = sld [smem:[#allocation4 + %s1703_s14]]  ;;  %p47_p7 = scmp.ge.s32.totalorder %s1705_s15, 2 }
  0x21   : > { %p1664_p8 = scmp.eq.s32.totalorder %s1254_s12, 0  ;;  %p125_p9 = scmp.ne.s32.totalorder %s1230_s30, %s1226_s29 }
  0x22   : > { %p1379_p10 = scmp.eq.s32.totalorder %s1659_s13, 0  ;;  %s1707_s15 = smov (%p47_p7, %s1705_s15), 0 }
  0x23   : > { %1671 = sst [smem:[#allocation21_spill]] %s1707_s15  ;;  %p1387_p11 = por %p1664_p8, %p119_p6 }
  0x24   : > { %p1393_p12 = por %p1379_p10, %p125_p9  ;;  %s1399_s22 = ssub.s32 %s1250_s11, %s1707_s15 }
  0x25   : > { %s1402_s23 = sld [smem:[#allocation4 + %s1246_s10]]  ;;  %p1663_p13 = scmp.lt.s32.totalorder %s1254_s12, 16 }
  0x26   : > { %s1673_s21 = scalar_select %p1393_p12, 1, 0 }
  0x27   : > { %s107_s24 = ssub.s32 %s105_s16, %s106_s18  ;;  %s223_s26 = sand.u32 1, %s1234_s7  }
  0x28   : > { %s109_s25 = sor.u32 %s1399_s22, %s107_s24  ;;  %s806_s27 = sshll.u32 %s223_s26, 7 }
  0x29   : > { %p110_p0 = scmp.eq.s32.totalorder %s109_s25, 0  ;;  %s807_s13 = sshll.u32 %s1250_s11, 5 }
  0x2a   : > { %s888_s15 = scalar_select %p1387_p11, [#allocation4], [#allocation12] }
  0x2b   : > { %s1408_s29 = scalar_select %p110_p0, %s1234_s7, %s112_s17  }
  0x2c   : > { %s889_s6 = scalar_select %p1387_p11, %s1246_s10, 0 }
  0x2d   : > { %1674 = sst [smem:[#allocation22_spill]] %s1408_s29  ;;  %s1709_s15 = smov (!%p1663_p13, %s888_s15), [#allocation14] }
  0x2e   : > { %s1711_s6 = smov (!%p1663_p13, %s889_s6), 0  ;;  %s227_s16 = scalar_lea.vmem [#allocation6], %s806_s27 }
  0x2f   : > { %s237_s18 = sshll.u32 %s227_s16, 4  ;;  %p1424_p1 = pnand %p1663_p13, %p1387_p11  ;;  %s1428_s18 = int_to_ptr.vmem [resolvable:$true] %s237_s18 }
  0x30   : > { %s228_s17 = sld [smem:[%s1709_s15 + %s1711_s6]]  ;;  %p814_p2 = scmp.ge.s32.totalorder %s1254_s12, 1 }
  0x31   : > { %p269_p3 = scmp.lt.s32.totalorder %s1254_s12, 17  ;;  %s1437_s20 = sld [smem:[#allocation4 + %s1703_s14]] }
  0x32   : > { %s1444_s6 = scalar_lea.sflag [#allocation7], %s223_s26  ;;  %p1070_p6 = pneg %p1424_p1 }
  0x33   : > { %p1432_p4 = pnand %p814_p2, %p269_p3  ;;  %s1073_s2 = scalar_lea.hbm %s1656_s4, 32768 }
  0x35   : > { %s1676_s25 = scalar_select %p1432_p4, 1, 0 }
  0x36   : > { %s808_s29 = sshll.u32 %s228_s17, 6 }
  0x37   : > { %s234_s27 = sadd.s32 %s808_s29, %s807_s13 }
  0x38   : > { %s809_s16 = sshll.u32 %s234_s27, 6 }
  0x39   : > { %s1442_s3 = scalar_lea.hbm %s1656_s4, %s809_s16 }
  0x3a   : > { %s1068_s15 = scalar_lea.hbm %s1442_s3, 2048  ;;  %p1074_p11 = scmp.lt.u32.totalorder %s1442_s3, %s1656_s4 }
  0x3b   : > { %p1069_p5 = scmp.ne.s32.totalorder %s1442_s3, %s1068_s15  ;;  %p1075_p0 = scmp.lt.u32.totalorder %s1073_s2, %s1068_s15 }
  0x3c   : > { %p1077_p3 = scmp.lt.u32.totalorder %s1068_s15, %s1442_s3 }
  0x3d   : > { %p1071_p7 = pnand %p1070_p6, %p1069_p5  ;;  %p1076_p2 = por %p1075_p0, %p1074_p11 }
  0x3f   : > { %p1072_p9 = pneg %p1071_p7  ;;  %p1078_p13 = por %p1077_p3, %p1076_p2 }
  0x41   : > { %p1079_p8 = pnand %p1078_p13, %p1072_p9 }
  0x43   : > { %1082 = shalt.err (!%p1079_p8)
}
  0x44   : > { %s1083_s26 = scalar_lea.vmem %s1428_s18, 2048  ;;  %s1257_s27 = smov [#allocation6]  }
  0x45   : > { %p1084_p5 = scmp.ne.s32.totalorder %s1428_s18, %s1083_s26  ;;  %s1088_s16 = sshll.u32 %s1257_s27, 4  ;;  %s1089_s16 = int_to_ptr.vmem [resolvable:$false] %s1088_s16 }
  0x46   : > { %s1090_s13 = scalar_lea.vmem %s1089_s16, 4096  ;;  %p1091_p4 = scmp.lt.s32.totalorder %s1428_s18, %s1089_s16 }
  0x47   : > { %p1086_p7 = pnand %p1084_p5, %p1070_p6  ;;  %p1092_p11 = scmp.lt.s32.totalorder %s1090_s13, %s1083_s26 }
  0x49   : > { %p1087_p12 = pneg %p1086_p7  ;;  %p1093_p0 = por %p1092_p11, %p1091_p4 }
  0x4b   : > { %p1094_p2 = pnand %p1093_p0, %p1087_p12 }
  0x4d   : > { %1097 = shalt.err (!%p1094_p2)
}
  0x4e   : > { %s1258_s15 = smov 128   ;;  %s1259_s29 = smov 8  }
  0x4f   : > { %905 = dma.hbm_to_vmem [thread:$0]  (!%p1424_p1), %s1442_s3, 2048, %s1428_s18, %s1444_s6, %s1258_s15, %s1258_s15, %s1259_s29  }
  0x50   : > { %p149_p8 = scmp.ne.s32.totalorder %s1222_s28, %s1218_s1  ;;  %p155_p12 = scmp.ne.s32.totalorder %s1218_s1, %s1214_s0 }
  0x51   : > { %s247_s2 = sand.u32 1, %s1222_s28   ;;  %p1677_p13 = scmp.eq.s32.totalorder %s1254_s12, 0 }
  0x52   : > { %p1481_p6 = por %p155_p12, %p1379_p10  ;;  %s137_s17 = ssub.s32 %s1402_s23, %s1437_s20 }
  0x53   : > { %p151_p4 = por %p149_p8, %p1677_p13  ;;  %s139_s26 = sor.u32 %s137_s17, %s1399_s22 }
  0x54   : > { %s142_s27 = sadd.s32 1, %s1222_s28  ;;  %p140_p9 = scmp.eq.s32.totalorder %s139_s26, 0 }
  0x55   : > { %s810_s16 = sshll.u32 %s247_s2, 6  ;;  %p1679_p1 = scmp.lt.s32.totalorder %s1254_s12, 16 }
  0x56   : > { %s891_s24 = scalar_select %p151_p4, [#allocation4], [#allocation13] }
  0x57   : > { %s1490_s13 = scalar_select %p140_p9, %s1222_s28, %s142_s27  }
  0x58   : > { %s892_s3 = scalar_select %p151_p4, %s1246_s10, 0 }
  0x59   : > { %s1713_s24 = smov (!%p1679_p1, %s891_s24), [#allocation15]  ;;  %p1680_p3 = pmov %p1679_p1 }
  0x5a   : > { %p1681_p5 = pmov %p1679_p1  ;;  %s251_s22 = scalar_lea.vmem [#allocation9], %s810_s16 }
  0x5b   : > { %s1715_s3 = smov (!%p1680_p3, %s892_s3), 0  ;;  %s261_s23 = sshll.u32 %s251_s22, 4  ;;  %s1504_s23 = int_to_ptr.vmem [resolvable:$true] %s261_s23 }
  0x5c   : > { %p1499_p7 = pnand %p1681_p5, %p151_p4  ;;  %s252_s19 = sld [smem:[%s1713_s24 + %s1715_s3]] }
  0x5d   : > { %s811_s18 = sshll.u32 %s1250_s11, 4  ;;  %s1511_s27 = scalar_lea.sflag [#allocation10], %s247_s2 }
  0x5e   : > { %p1100_p11 = pneg %p1499_p7 }
  0x62   : > { %s812_s20 = sshll.u32 %s252_s19, 5  ;;  %s1103_s19 = scalar_lea.hbm %s1657_s5, 16384 }
  0x63   : > { %s258_s6 = sadd.s32 %s812_s20, %s811_s18 }
  0x64   : > { %s813_s15 = sshll.u32 %s258_s6, 6 }
  0x65   : > { %s1509_s26 = scalar_lea.hbm %s1657_s5, %s813_s15 }
  0x66   : > { %s1098_s24 = scalar_lea.hbm %s1509_s26, 1024  ;;  %p1104_p8 = scmp.lt.u32.totalorder %s1509_s26, %s1657_s5 }
  0x67   : > { %p1099_p10 = scmp.ne.s32.totalorder %s1509_s26, %s1098_s24  ;;  %p1105_p12 = scmp.lt.u32.totalorder %s1103_s19, %s1098_s24 }
  0x68   : > { %p1107_p4 = scmp.lt.u32.totalorder %s1098_s24, %s1509_s26 }
  0x69   : > { %p1101_p0 = pnand %p1100_p11, %p1099_p10  ;;  %p1106_p13 = por %p1105_p12, %p1104_p8 }
  0x6b   : > { %p1102_p2 = pneg %p1101_p0  ;;  %p1108_p9 = por %p1107_p4, %p1106_p13 }
  0x6d   : > { %p1109_p1 = pnand %p1108_p9, %p1102_p2 }
  0x6f   : > { %1112 = shalt.err (!%p1109_p1)
}
  0x70   : > { %s1113_s2 = scalar_lea.vmem %s1504_s23, 1024  ;;  %s1260_s20 = smov [#allocation9]  }
  0x71   : > { %p1114_p3 = scmp.ne.s32.totalorder %s1504_s23, %s1113_s2  ;;  %s1118_s6 = sshll.u32 %s1260_s20, 4  ;;  %s1119_s6 = int_to_ptr.vmem [resolvable:$false] %s1118_s6 }
  0x72   : > { %s1120_s15 = scalar_lea.vmem %s1119_s6, 2048  ;;  %p1121_p0 = scmp.lt.s32.totalorder %s1504_s23, %s1119_s6 }
  0x73   : > { %p1116_p5 = pnand %p1114_p3, %p1100_p11  ;;  %p1122_p8 = scmp.lt.s32.totalorder %s1120_s15, %s1113_s2 }
  0x75   : > { %p1117_p10 = pneg %p1116_p5  ;;  %p1123_p12 = por %p1122_p8, %p1121_p0 }
  0x77   : > { %p1124_p13 = pnand %p1123_p12, %p1117_p10 }
  0x79   : > { %1127 = shalt.err (!%p1124_p13)
}
  0x7a   : > { %s1261_s29 = smov 64   ;;  %s1262_s17 = smov 4  }
  0x7b   : > { %910 = dma.hbm_to_vmem [thread:$0]  (!%p1499_p7), %s1509_s26, 1024, %s1504_s23, %s1511_s27, %s1261_s29, %s1261_s29, %s1262_s17  }
  0x7c   : > { %p1683_p11 = scmp.ne.s32.totalorder %s1676_s25, 0 }
  0x7d   : > { %s275_s24 = sand.u32 (!%p1683_p11), 1, %s1230_s30   ;;  %p1684_p2 = scmp.ne.s32.totalorder (!%p1683_p11), %s1673_s21, 0 }
  0x7e   : > { %273 = sbr.rel (%p1683_p11) target bundleno = 698 (0x2ba), region = 36  ;;  %s815_s16 = sshll.u32 (!%p1683_p11), %s275_s24, 7 }
  0x7f   : > { %s276_s3 = scalar_lea.sflag (!%p1683_p11), [#allocation7], %s275_s24  ;;  %s1542_s19 = scalar_lea.vmem (!%p1683_p11), [#allocation6], %s815_s16 }
  0x85   : > { %1201 = dma.done.wait (%p1684_p2), %s276_s3, 2048  }
  0x86   : > { %1203 = vsyncadd (%p1684_p2), %s276_s3, 4294965248  ;;  %s284_s22 = sand.u32 1, %s1218_s1  }
  0x87   : > { %s816_s0 = sshll.u32 %s284_s22, 6  ;;  %s285_s23 = scalar_lea.sflag [#allocation10], %s284_s22 }
  0x88   : > { %s1549_s26 = scalar_lea.vmem [#allocation9], %s816_s0 }
  0x89   : > { %1205 = dma.done.wait (%p1481_p6), %s285_s23, 1024  }
  0x8a   : > { %1207 = vsyncadd (%p1481_p6), %s285_s23, 4294966272  ;;  %p339_p7 = scmp.eq.s32.totalorder %s1242_s9, 0  ;;  %p340_p4 = scmp.eq.s32.totalorder %s1238_s8, 0 }
  0x8c   : > { %p341_p9 = pnand %p340_p4, %p339_p7 }
  0x8d   : > { %v1263_v0 = vmov (!%p341_p9), 0.0  }
  0x8e   : > { %344 = sbr.rel (%p341_p9) target bundleno = 149 (0x95), region = 48  ;;  %345 = vst [vmem:[#allocation2] sm:$0xff] (!%p341_p9), %v1263_v0  ;;  %346 = vst [vmem:[#allocation2 + $0x8] sm:$0xff] (!%p341_p9), %v1263_v0 }
  0x95 PF: > { %s347_s21 = sld [smem:[#allocation5]] }
  0x9b   : > { %p817_p1 = scmp.ge.s32.totalorder %s1238_s8, %s347_s21 }
  0x9c   : > { %v1015_v1 = vld [vmem:[%s1542_s19 + $0x4] ss:$8 sps:$4 sm:$0xff] (!%p817_p1)   ;;  %v1017_v2 = vld [vmem:[%s1542_s19] ss:$8 sps:$4 sm:$0xff] (!%p817_p1)   ;;  %v1264_v3 = vmov (!%p817_p1), 0   ;;  %s1685_s27 = sld [smem:[#allocation24_spill]] (!%p817_p1) }
  0x9d   : > { %351 = sbr.rel (%p817_p1) target bundleno = 655 (0x28f), region = 52  ;;  %504 = vmatprep.mubr.bf16.mxu0 (!%p817_p1), %v1264_v3  ;;  %1014 = vset.pattern.permute.xlu0 (!%p817_p1), %v1264_v3  ;;  %v1018_v4 = vld [vmem:[%s1542_s19 + $0x14] ss:$8 sps:$4 sm:$0xff] (!%p817_p1)   ;;  %v1020_v5 = vld [vmem:[%s1542_s19 + $0x10] ss:$8 sps:$4 sm:$0xff] (!%p817_p1)   ;;  %v1040_v19 = vld [vmem:[%s1549_s26] sm:$0xff] (!%p817_p1)  }
  0x9e   : > { %472 = vmatprep.subr.bf16.mxu0 (!%p817_p1), %v1015_v1  ;;  %v1021_v6 = vld [vmem:[%s1542_s19 + $0x24] ss:$8 sps:$4 sm:$0xff] (!%p817_p1)   ;;  %v1023_v7 = vld [vmem:[%s1542_s19 + $0x20] ss:$8 sps:$4 sm:$0xff] (!%p817_p1)   ;;  %v1024_v8 = vld [vmem:[%s1542_s19 + $0x34] ss:$8 sps:$4 sm:$0xff] (!%p817_p1)  }
  0x9f   : > { %473 = vmatpush1.bf16.msra.mxu0 (!%p817_p1), %v1017_v2  ;;  %v1026_v9 = vld [vmem:[%s1542_s19 + $0x30] ss:$8 sps:$4 sm:$0xff] (!%p817_p1)   ;;  %v1027_v10 = vld [vmem:[%s1542_s19 + $0x44] ss:$8 sps:$4 sm:$0xff] (!%p817_p1)   ;;  %v1029_v11 = vld [vmem:[%s1542_s19 + $0x40] ss:$8 sps:$4 sm:$0xff] (!%p817_p1)  }
  0xa0   : > { %474 = vmatprep.subr.bf16.mxu0 (!%p817_p1), %v1018_v4  ;;  %v1030_v12 = vld [vmem:[%s1542_s19 + $0x54] ss:$8 sps:$4 sm:$0xff] (!%p817_p1)   ;;  %v1032_v13 = vld [vmem:[%s1542_s19 + $0x50] ss:$8 sps:$4 sm:$0xff] (!%p817_p1)   ;;  %v1033_v14 = vld [vmem:[%s1542_s19 + $0x64] ss:$8 sps:$4 sm:$0xff] (!%p817_p1)  }
  0xa1   : > { %v1035_v15 = vld [vmem:[%s1542_s19 + $0x60] ss:$8 sps:$4 sm:$0xff] (!%p817_p1)   ;;  %v1036_v16 = vld [vmem:[%s1542_s19 + $0x74] ss:$8 sps:$4 sm:$0xff] (!%p817_p1)   ;;  %v1038_v17 = vld [vmem:[%s1542_s19 + $0x70] ss:$8 sps:$4 sm:$0xff] (!%p817_p1)  }
  0xa2   : > { %v1039_v18 = vld [vmem:[%s1685_s27] sm:$0xff] (!%p817_p1)   ;;  %v1265_v20 = vmov (!%p817_p1), 0.0   ;;  %v1041_v21 = vld [vmem:[%s1549_s26 + $0x8] sm:$0xff] (!%p817_p1)   ;;  %v1043_v23 = vld [vmem:[%s1549_s26 + $0x18] sm:$0xff] (!%p817_p1)   ;;  %vm1266_vm0 = vmmov (!%p817_p1), 0   ;;  %s845_s18 = sshll.u32 (!%p817_p1), %s1238_s8, 4 }
  0xa3   : > { %475 = vmatpush1.bf16.msra.mxu0 (!%p817_p1), %v1020_v5  ;;  %868 = vmatprep.subr.bf16.mxu1 (!%p817_p1), %v1265_v20  ;;  %v1042_v22 = vld [vmem:[%s1549_s26 + $0x10] sm:$0xff] (!%p817_p1)   ;;  %v1044_v24 = vld [vmem:[%s1549_s26 + $0x20] sm:$0xff] (!%p817_p1)   ;;  %v1045_v25 = vld [vmem:[%s1549_s26 + $0x28] sm:$0xff] (!%p817_p1)   ;;  %s1686_s6 = sld [smem:[#allocation23_spill]] (!%p817_p1) }
  0xa4   : > { %476 = vmatprep.subr.bf16.mxu0 %v1021_v6  ;;  %869 = vmatpush3.bf16.msra.mxu1 %v1040_v19  ;;  %v1046_v26 = vld [vmem:[%s1549_s26 + $0x30] sm:$0xff]   ;;  %v1047_v27 = vld [vmem:[%s1549_s26 + $0x38] sm:$0xff]  }
  0xa5   : > { %870 = vmatprep.subr.bf16.mxu1 %v1265_v20  ;;  %884 = vmatprep.mubr.msk.bf16.mxu1 %vm1266_vm0, %v1265_v20  ;;  %v625_v49 = vld [vmem:[#allocation2] sm:$0xff]  ;;  %v626_v54 = vld [vmem:[#allocation2 + $0x8] sm:$0xff] }
  0xa7   : > { %477 = vmatpush1.bf16.msra.mxu0 %v1023_v7 }
  0xa8   : > { %478 = vmatprep.subr.bf16.mxu0 %v1024_v8  ;;  %871 = vmatpush3.bf16.msra.mxu1 %v1041_v21 }
  0xa9   : > { %872 = vmatprep.subr.bf16.mxu1 %v1265_v20  ;;  %s622_s15 = scalar_lea.vmem %s1686_s6, %s845_s18 }
  0xaa   : > { %v623_v28 = vld [vmem:[%s622_s15] sm:$0xff]  ;;  %v624_v29 = vld [vmem:[%s622_s15 + $0x8] sm:$0xff] }
  0xab   : > { %479 = vmatpush1.bf16.msra.mxu0 %v1026_v9  ;;  %629 = vperm.xlu0 %1014, %v623_v28  }
  0xac   : > { %480 = vmatprep.subr.bf16.mxu0 %v1027_v10  ;;  %873 = vmatpush3.bf16.msra.mxu1 %v1042_v22 }
  0xad   : > { %874 = vmatprep.subr.bf16.mxu1 %v1265_v20 }
  0xaf   : > { %481 = vmatpush1.bf16.msra.mxu0 %v1029_v11  ;;  %634 = vperm.xlu0 %1014, %v624_v29  }
  0xb0   : > { %482 = vmatprep.subr.bf16.mxu0 %v1030_v12  ;;  %875 = vmatpush3.bf16.msra.mxu1 %v1043_v23 }
  0xb1   : > { %876 = vmatprep.subr.bf16.mxu1 %v1265_v20 }
  0xb3   : > { %483 = vmatpush1.bf16.msra.mxu0 %v1032_v13 }
  0xb4   : > { %484 = vmatprep.subr.bf16.mxu0 %v1033_v14  ;;  %877 = vmatpush3.bf16.msra.mxu1 %v1044_v24 }
  0xb5   : > { %878 = vmatprep.subr.bf16.mxu1 %v1265_v20 }
  0xb7   : > { %485 = vmatpush1.bf16.msra.mxu0 %v1035_v15 }
  0xb8   : > { %486 = vmatprep.subr.bf16.mxu0 %v1036_v16  ;;  %879 = vmatpush3.bf16.msra.mxu1 %v1045_v25 }
  0xb9   : > { %880 = vmatprep.subr.bf16.mxu1 %v1265_v20 }
  0xbb   : > { %487 = vmatpush1.bf16.msra.mxu0 %v1038_v17 }
  0xbc   : > { %881 = vmatpush3.bf16.msra.mxu1 %v1046_v26 }
  0xbd   : > { %882 = vmatprep.subr.bf16.mxu1 %v1265_v20 }
  0xbe   : > { %505 = vmatmul.mubr.bf16.vlgmr.msra.gmra.mrb[0].mxu0 %v1039_v18 }
  0xc0   : > { %883 = vmatpush3.bf16.msra.mxu1 %v1047_v27 }
 0x12a   : > { %v630_v47 = vpop.permute.xlu0 %629 }
 0x12e   : > { %v635_v52 = vpop.permute.xlu0 %634 }
 0x191   : > { %v506_v30 = vpop.f32.mrb[0].mxu0 }
 0x192   : > { %v835_v31 = vmul.f32 -1.442695, %v506_v30  ;;  %v508_v32 = vpop.f32.mrb[1].mxu0 }
 0x193   : > { %v510_v33 = vpop.f32.mrb[2].mxu0 }
 0x194   : > { %1048 = vpow2.f32 %v835_v31  ;;  %v836_v34 = vmul.f32 -1.442695, %v510_v33  ;;  %v512_v35 = vpop.f32.mrb[3].mxu0 }
 0x196   : > { %1050 = vpow2.f32 %v836_v34 }
 0x19e   : > { %v1049_v36 = vpop.eup %1048 }
 0x19f   : > { %v521_v37 = vadd.f32 1.0, %v1049_v36 }
 0x1a0   : > { %v1051_v38 = vpop.eup %1050 }
 0x1a1   : > { %1052 = vrcp.f32 %v521_v37  ;;  %v522_v39 = vadd.f32 1.0, %v1051_v38 }
 0x1a3   : > { %1054 = vrcp.f32 %v522_v39 }
 0x1ab   : > { %v1053_v40 = vpop.eup %1052 }
 0x1ac   : > { %v527_v41 = vmul.f32 %v1053_v40, %v506_v30 }
 0x1ad   : > { %v1055_v42 = vpop.eup %1054 }
 0x1ae   : > { %v529_v43 = vmul.f32 %v527_v41, %v508_v32  ;;  %v528_v44 = vmul.f32 %v1055_v42, %v510_v33 }
 0x1b0   : > { %v530_v45 = vmul.f32 %v528_v44, %v512_v35 }
 0x1b2   : > { %v531_v46 = vpack.c.bf16 %v530_v45, %v529_v43 }
 0x1b4   : > { %885 = vmatmul.mubr.bf16.vlgmr.msra.gmra.mrb[0].mxu1 %v531_v46 }
 0x287   : > { %v614_v48 = vpop.f32.mrb[0].mxu1 }
 0x288   : > { %v637_v50 = vmul.f32 %v630_v47, %v614_v48  ;;  %v886_v51 = vpop.f32.mrb[1].mxu1 }
 0x289   : > { %v617_v53 = vpop.f32.mrb[2].mxu1 }
 0x28a   : > { %v639_v55 = vadd.f32 %v637_v50, %v625_v49  ;;  %v638_v56 = vmul.f32 %v635_v52, %v617_v53  ;;  %v887_v57 = vpop.f32.mrb[3].mxu1 }
 0x28c   : > { %641 = vst [vmem:[#allocation2] sm:$0xff] %v639_v55  ;;  %v640_v58 = vadd.f32 %v638_v56, %v626_v54 }
 0x28e   : > { %642 = vst [vmem:[#allocation2 + $0x8] sm:$0xff] %v640_v58 }
 0x28f PF: > { %p643_p6 = scmp.eq.s32.totalorder %s1242_s9, 1  ;;  %p644_p3 = scmp.eq.s32.totalorder %s1238_s8, 7 }
 0x291   : > { %p645_p5 = pnand %p644_p3, %p643_p6 }
 0x293   : > { %648 = sbr.rel (%p645_p5) target bundleno = 666 (0x29a), region = 56  ;;  %v649_v59 = vld [vmem:[#allocation2] sm:$0xff] (!%p645_p5) }
 0x295   : > { %v650_v60 = vld [vmem:[#allocation2 + $0x8] sm:$0xff] (!%p645_p5) }
 0x296   : > { %v857_v61 = vpack.c.bf16 (!%p645_p5), %v650_v60, %v649_v59 }
 0x298   : > { %858 = vst [vmem:[#allocation11] sm:$0xff] (!%p645_p5), %v857_v61  }
 0x29a PF: > { %s1687_s29 = sadd.s32 4294967295, %s1254_s12   ;;  %s1267_s24 = smov [#allocation11]  }
 0x29b   : > { %p1593_p10 = scmp.eq.s32.totalorder %s1687_s29, 15  ;;  %s670_s16 = sshll.u32 %s1267_s24, 4  ;;  %s671_s16 = int_to_ptr.vmem [resolvable:$true] %s670_s16 }
 0x29c   : > { %s1128_s3 = scalar_lea.vmem %s671_s16, 128  ;;  %p1135_p13 = scmp.lt.s32.totalorder %s671_s16, %s671_s16 }
 0x29d   : > { %p1129_p0 = scmp.ne.s32.totalorder %s671_s16, %s1128_s3  ;;  %p1136_p11 = scmp.lt.s32.totalorder %s1128_s3, %s1128_s3 }
 0x29f   : > { %p1130_p8 = pnand %p1129_p0, %p1593_p10  ;;  %p1137_p2 = por %p1136_p11, %p1135_p13 }
 0x2a1   : > { %p1131_p12 = pneg %p1130_p8 }
 0x2a3   : > { %p1138_p7 = pnand %p1137_p2, %p1131_p12 }
 0x2a5   : > { %1141 = shalt.err (!%p1138_p7)
}
 0x2a6   : > { %s1689_s19 = sld [smem:[#allocation25_spill]] }
 0x2ac   : > { %s1142_s22 = scalar_lea.hbm %s1689_s19, 128 }
 0x2ad   : > { %p1143_p4 = scmp.ne.s32.totalorder %s1689_s19, %s1142_s22  ;;  %p1148_p6 = scmp.lt.u32.totalorder %s1142_s22, %s1689_s19 }
 0x2af   : > { %p1144_p9 = pnand %p1143_p4, %p1593_p10 }
 0x2b1   : > { %p1145_p1 = pneg %p1144_p9 }
 0x2b3   : > { %p1150_p3 = pnand %p1148_p6, %p1145_p1 }
 0x2b5   : > { %1153 = shalt.err (!%p1150_p3)
}
 0x2b6   : > { %s1268_s25 = smov 64   ;;  %s1269_s7 = smov 4  }
 0x2b7   : > { %897 = dma.vmem_to_hbm [thread:$0]  (%p1593_p10), %s671_s16, 128, %s1689_s19, [#allocation8], %s1268_s25, %s1268_s25, %s1269_s7  }
 0x2b8   : > { %1209 = dma.done.wait (%p1593_p10), [#allocation8], 128  }
 0x2b9   : > { %1211 = vsyncadd (%p1593_p10), [#allocation8], 4294967168 }
 0x2ba PF: > { %s30_s12 = sadd.s32 1, %s1254_s12   ;;  %s1690_s2 = sld [smem:[#allocation20_spill]] }
 0x2bb   : > { %p27_p5 = scmp.ge.s32.totalorder %s30_s12, 18   ;;  %s1691_s7 = sld [smem:[#allocation22_spill]] }
 0x2bc   : > { %s1692_s20 = sld [smem:[#allocation21_spill]]  ;;  %s1693_s0 = smov %s1218_s1 }
 0x2bd   : > { %s1694_s1 = smov %s1222_s28  ;;  %s1695_s28 = smov %s1490_s13 }
 0x2be   : > { %s1696_s29 = smov %s1230_s30  ;;  %s1698_s8 = smov %s1246_s10 }
 0x2bf   : > { %s1699_s9 = smov %s1250_s11  ;;  %s1700_s10 = smov %s1703_s14 }
 0x2c0   : > { %s1697_s30 = smov %s1690_s2  ;;  %29 = sbr.rel (!%p27_p5) target bundleno = 27 (0x1b), region = 106 }
 0x2c2   : > { %s1701_s11 = smov %s1692_s20 }
 0x2c7   :  { %686 = vsyncpa [#allocation7], 1 }
 0x2c8   :  { %688 = vsyncpa [#allocation7 + $0x1], 1 }
 0x2c9   :  { %689 = vsyncpa [#allocation10], 1 }
 0x2ca   :  { %691 = vsyncpa [#allocation10 + $0x1], 1 }
 0x2cb   :  { %692 = vsyncpa [#allocation8], 1 }
 0x2cc   :  { %694 = vsyncpa [#allocation8 + $0x1], 1 }

</bundles_post_ra>
